<compile_context>
chip_gen: v5e
topology: v5e:2x2
jax: 0.10.0
libtpu: 0.0.40
codegen_flags: <defaults>
</compile_context>

<pallas_src>
import functools

import jax
import jax.numpy as jnp
from jax.experimental import pallas as pl
from jax.experimental.pallas import tpu as pltpu


def _round_up(x, m):
    return (x + m - 1) // m * m


# ---------------------------------------------------------------------------
# Pallas kernels
# ---------------------------------------------------------------------------
def _make_matmul_kernel(apply_affine, slope, emit_stats):
    """Builds the fused matmul(+affine)(+LeakyReLU)(+stats) kernel body."""
    apply_act = (slope != 1.0)

    def kernel(*refs):
        idx = 0
        x_ref = refs[idx]; idx += 1
        w_ref = refs[idx]; idx += 1
        if apply_affine:
            scale_ref = refs[idx]; idx += 1
            bias_ref = refs[idx]; idx += 1
        o_ref = refs[idx]; idx += 1
        if emit_stats:
            sum_ref = refs[idx]; idx += 1
            sq_ref = refs[idx]; idx += 1
        acc_ref = refs[idx]

        k = pl.program_id(2)

        @pl.when(k == 0)
        def _():
            acc_ref[...] = jnp.zeros_like(acc_ref)

        acc_ref[...] += jnp.dot(x_ref[...], w_ref[...],
                                preferred_element_type=jnp.float32)

        @pl.when(k == pl.num_programs(2) - 1)
        def _():
            y = acc_ref[...]
            if apply_affine:
                y = y * scale_ref[...] + bias_ref[...]
            if apply_act:
                y = jnp.where(y >= 0, y, slope * y)
            o_ref[...] = y
            if emit_stats:
                s = jnp.sum(y, axis=0, keepdims=True)
                q = jnp.sum(y * y, axis=0, keepdims=True)
                sum_ref[...] = jnp.broadcast_to(s, sum_ref.shape)
                sq_ref[...] = jnp.broadcast_to(q, sq_ref.shape)

    return kernel


def matmul_fused(patches, weights, *, scale=None, bias=None, slope=1.0,
                 emit_stats=False, tm=256, tn=256, tk=512):
    """out = leaky(patches @ W [* scale + bias]); optionally also emits
    per-M-tile partial column sums / sums-of-squares of the output.

    patches: (M, K) f32, weights: (K, N) f32, scale/bias: (N,) f32 or None.
    MXU inputs are bf16; accumulation and epilogue are f32.
    """
    M, K = patches.shape
    K2, N = weights.shape
    assert K == K2
    apply_affine = scale is not None

    # Tile sizes: multiples of 16 (bf16 sublane) / 128 (lane); shrink for tiny
    # problems so blocks never exceed the (padded) array.
    tm = min(tm, _round_up(M, 16))
    tn = min(tn, _round_up(N, 128))
    tk = min(tk, _round_up(K, 128))
    Mp = _round_up(M, tm)
    Np = _round_up(N, tn)
    Kp = _round_up(K, tk)
    gm, gn, gk = Mp // tm, Np // tn, Kp // tk

    # Single pad (no zeros().at[].set() double copy), cast MXU operands to bf16.
    xp = jnp.pad(patches.astype(jnp.float32),
                 ((0, Mp - M), (0, Kp - K))).astype(jnp.bfloat16)
    wp = jnp.pad(weights.astype(jnp.float32),
                 ((0, Kp - K), (0, Np - N))).astype(jnp.bfloat16)

    inputs = [xp, wp]
    in_specs = [
        pl.BlockSpec((tm, tk), lambda i, j, k: (i, k)),
        pl.BlockSpec((tk, tn), lambda i, j, k: (k, j)),
    ]
    if apply_affine:
        sp = jnp.pad(scale.astype(jnp.float32), ((0, Np - N),)).reshape(1, Np)
        bp = jnp.pad(bias.astype(jnp.float32), ((0, Np - N),)).reshape(1, Np)
        inputs += [sp, bp]
        in_specs += [
            pl.BlockSpec((1, tn), lambda i, j, k: (0, j)),
            pl.BlockSpec((1, tn), lambda i, j, k: (0, j)),
        ]

    out_shapes = [jax.ShapeDtypeStruct((Mp, Np), jnp.float32)]
    out_specs = [pl.BlockSpec((tm, tn), lambda i, j, k: (i, j))]
    if emit_stats:
        # One (8, tn) slab per (M-tile, N-tile); value replicated over the 8
        # sublanes to keep the block sublane-aligned.
        out_shapes += [jax.ShapeDtypeStruct((gm * 8, Np), jnp.float32)] * 2
        out_specs += [pl.BlockSpec((8, tn), lambda i, j, k: (i, j))] * 2

    kernel = _make_matmul_kernel(apply_affine, slope, emit_stats)

    result = pl.pallas_call(
        kernel,
        out_shape=tuple(out_shapes),
        grid_spec=pltpu.PrefetchScalarGridSpec(
            num_scalar_prefetch=0,
            grid=(gm, gn, gk),
            in_specs=in_specs,
            out_specs=tuple(out_specs),
            scratch_shapes=[pltpu.VMEM((tm, tn), jnp.float32)],
        ),
        compiler_params=pltpu.CompilerParams(
            dimension_semantics=("parallel", "parallel", "arbitrary")),
    )(*inputs)

    if emit_stats:
        out, psum, psq = result
        psum = psum.reshape(gm, 8, Np)[:, 0, :N]   # (gm, N) partial sums
        psq = psq.reshape(gm, 8, Np)[:, 0, :N]
        return out[:M, :N], psum, psq
    (out,) = result
    return out[:M, :N]


def _affine_leaky_kernel(x_ref, scale_ref, bias_ref, o_ref, *, slope):
    y = x_ref[...] * scale_ref[...] + bias_ref[...]
    o_ref[...] = jnp.where(y >= 0, y, slope * y)


def affine_leaky(x, scale, bias, slope, *, tm=512):
    """Per-channel affine + LeakyReLU (applies the folded BatchNorm), tiled
    over rows so VMEM stays bounded and the pipeline overlaps DMA/compute."""
    M, N = x.shape
    Np = _round_up(max(N, 128), 128)
    tm = min(tm, _round_up(M, 8))
    Mp = _round_up(M, tm)

    xp = jnp.pad(x.astype(jnp.float32), ((0, Mp - M), (0, Np - N)))
    sp = jnp.pad(scale.astype(jnp.float32), ((0, Np - N),)).reshape(1, Np)
    bp = jnp.pad(bias.astype(jnp.float32), ((0, Np - N),)).reshape(1, Np)

    out = pl.pallas_call(
        functools.partial(_affine_leaky_kernel, slope=slope),
        out_shape=jax.ShapeDtypeStruct((Mp, Np), jnp.float32),
        grid_spec=pltpu.PrefetchScalarGridSpec(
            num_scalar_prefetch=0,
            grid=(Mp // tm,),
            in_specs=[
                pl.BlockSpec((tm, Np), lambda i: (i, 0)),
                pl.BlockSpec((1, Np), lambda i: (0, 0)),
                pl.BlockSpec((1, Np), lambda i: (0, 0)),
            ],
            out_specs=pl.BlockSpec((tm, Np), lambda i: (i, 0)),
        ),
        compiler_params=pltpu.CompilerParams(
            dimension_semantics=("parallel",)),
    )(xp, sp, bp)
    return out[:M, :N]


# ---------------------------------------------------------------------------
# JAX glue: reflect padding + im2col (layout plumbing only)
# ---------------------------------------------------------------------------
# TODO(synk): move the kh*kw tap loop into the matmul kernel (strided DMA of
# the padded NHWC activation per tap) to avoid materializing the ~16x-inflated
# im2col patches matrix in HBM at large image sizes.
def _reflect_pad_nhwc(x, pad=1):
    return jnp.pad(x, ((0, 0), (pad, pad), (pad, pad), (0, 0)), mode="reflect")


def _im2col(x, k, stride):
    N, H, W, C = x.shape
    oh = (H - k) // stride + 1
    ow = (W - k) // stride + 1
    cols = []
    for i in range(k):
        for j in range(k):
            cols.append(x[:, i:i + stride * (oh - 1) + 1:stride,
                          j:j + stride * (ow - 1) + 1:stride, :])
    p = jnp.stack(cols, axis=3)            # (N, oh, ow, k*k, C)
    return p.reshape(N * oh * ow, k * k * C), (N, oh, ow)


def _conv_bias_leaky(h_nhwc, w_hwio, stride, bias, slope):
    """Conv2d(pad=1, reflect) + bias + (optional) LeakyReLU, fused in-kernel."""
    kh, kw, cin, cout = w_hwio.shape
    xp = _reflect_pad_nhwc(h_nhwc, 1)
    patches, (n, oh, ow) = _im2col(xp, kh, stride)
    wmat = w_hwio.reshape(kh * kw * cin, cout)
    out = matmul_fused(patches, wmat,
                       scale=jnp.ones((cout,), jnp.float32),
                       bias=bias, slope=slope)
    return out.reshape(n, oh, ow, cout)


def _conv_raw_with_stats(h_nhwc, w_hwio, stride):
    """Conv2d(pad=1, reflect, bias=False); also returns per-tile partial
    column sums / sums-of-squares for the BatchNorm that follows."""
    kh, kw, cin, cout = w_hwio.shape
    xp = _reflect_pad_nhwc(h_nhwc, 1)
    patches, (n, oh, ow) = _im2col(xp, kh, stride)
    wmat = w_hwio.reshape(kh * kw * cin, cout)
    out, psum, psq = matmul_fused(patches, wmat, slope=1.0, emit_stats=True)
    return out, psum, psq, (n, oh, ow)


# ---------------------------------------------------------------------------
# PatchDiscriminator forward
# ---------------------------------------------------------------------------
def init_params(key, in_channels=1, features=(64, 128, 256, 512), k=4):
    keys = jax.random.split(key, 8)
    params = {}
    params["initial_w"] = 0.02 * jax.random.normal(
        keys[0], (k, k, in_channels * 2, features[0]), jnp.float32)
    params["initial_b"] = jnp.zeros((features[0],), jnp.float32)
    blocks = []
    cin = features[0]
    for idx, f in enumerate(features[1:]):
        stride = 1 if f == features[-1] else 2
        w = 0.02 * jax.random.normal(keys[1 + idx], (k, k, cin, f), jnp.float32)
        blocks.append(dict(w=w,
                           gamma=jnp.ones((f,), jnp.float32),
                           beta=jnp.zeros((f,), jnp.float32),
                           stride=stride))
        cin = f
    params["blocks"] = blocks
    params["final_w"] = 0.02 * jax.random.normal(
        keys[7], (k, k, cin, 1), jnp.float32)
    params["final_b"] = jnp.zeros((1,), jnp.float32)
    return params


def patch_discriminator_forward(params, x_nchw, y_nchw, *, slope=0.2, eps=1e-5):
    # concat along channels (PyTorch dim=1), then NCHW -> NHWC internally.
    h = jnp.concatenate([x_nchw, y_nchw], axis=1)
    h = jnp.transpose(h, (0, 2, 3, 1)).astype(jnp.float32)

    # initial: Conv(stride=2, bias=True) + LeakyReLU(0.2), fused epilogue.
    h = _conv_bias_leaky(h, params["initial_w"], stride=2,
                         bias=params["initial_b"], slope=slope)

    # CNNBlocks: Conv(bias=False) -> BatchNorm2d (batch stats) -> LeakyReLU.
    for blk in params["blocks"]:
        cout = blk["w"].shape[-1]
        raw, psum, psq, (n, oh, ow) = _conv_raw_with_stats(
            h, blk["w"], blk["stride"])
        m_rows = n * oh * ow
        mean = jnp.sum(psum, axis=0) / m_rows
        ex2 = jnp.sum(psq, axis=0) / m_rows
        var = jnp.maximum(ex2 - mean * mean, 0.0)     # biased, like PyTorch fwd
        inv = 1.0 / jnp.sqrt(var + eps)
        bn_scale = blk["gamma"] * inv
        bn_bias = blk["beta"] - mean * bn_scale
        flat = affine_leaky(raw, bn_scale, bn_bias, slope)
        h = flat.reshape(n, oh, ow, cout)

    # final: Conv(stride=1, bias=True), no activation (slope=1 -> identity).
    h = _conv_bias_leaky(h, params["final_w"], stride=1,
                         bias=params["final_b"], slope=1.0)

    return jnp.transpose(h, (0, 3, 1, 2))             # NHWC -> NCHW


if __name__ == "__main__":
    key = jax.random.PRNGKey(0)
    kp, kx, ky = jax.random.split(key, 3)

    params = init_params(kp, in_channels=1)

    # Reflect padding requires every intermediate spatial size >= 2,
    # so 32x32 is the smallest clean power-of-two input.
    x = jax.random.normal(kx, (2, 1, 32, 32), jnp.float32)
    y = jax.random.normal(ky, (2, 1, 32, 32), jnp.float32)

    out = patch_discriminator_forward(params, x, y)
    out = jax.block_until_ready(out)

    assert out.shape == (2, 1, 2, 2), out.shape
    assert out.dtype == jnp.float32
    print("KERNEL_OK")
</pallas_src>

<mosaic_0001>
module attributes {stable_mosaic.version = 11 : i64} {
  func.func @kernel(%arg0: i32, %arg1: i32, %arg2: i32, %arg3: memref<256x128xbf16, #tpu.memory_space<vmem>>, %arg4: memref<128x128xbf16, #tpu.memory_space<vmem>>, %arg5: memref<1x128xf32, #tpu.memory_space<vmem>>, %arg6: memref<1x128xf32, #tpu.memory_space<vmem>>, %arg7: memref<256x128xf32, #tpu.memory_space<vmem>>, %arg8: memref<256x128xf32, #tpu.memory_space<vmem>>) attributes {dimension_semantics = [#tpu.dimension_semantics<parallel>, #tpu.dimension_semantics<parallel>, #tpu.dimension_semantics<arbitrary>], iteration_bounds = array<i64: 2, 1, 1>, scalar_prefetch = 0 : i64, scratch_operands = 1 : i64, tpu.core_type = #tpu.core_type<tc>, window_params = [{transform_indices = @transform_0, window_bounds = array<i64: 256, 128>}, {transform_indices = @transform_1, window_bounds = array<i64: 128, 128>}, {transform_indices = @transform_2, window_bounds = array<i64: 1, 128>}, {transform_indices = @transform_3, window_bounds = array<i64: 1, 128>}, {transform_indices = @transform_4, window_bounds = array<i64: 256, 128>}]} {
    %c0_i32 = arith.constant 0 : i32
    %0 = arith.cmpi eq, %arg2, %c0_i32 : i32
    %1 = arith.extui %0 : i1 to i32
    %c0_i32_0 = arith.constant 0 : i32
    %2 = arith.cmpi ne, %1, %c0_i32_0 : i32
    scf.if %2 {
      %cst_10 = arith.constant 0.000000e+00 : f32
      %12 = vector.broadcast %cst_10 : f32 to vector<256x128xf32>
      %c0_11 = arith.constant 0 : index
      %c0_12 = arith.constant 0 : index
      %13 = vector.load %arg8[%c0_11, %c0_12] : memref<256x128xf32, #tpu.memory_space<vmem>>, vector<256x128xf32>
      tpu.vector_store %arg8[%c0_11, %c0_12], %12 {strides = array<i32>} : memref<256x128xf32, #tpu.memory_space<vmem>>, vector<256x128xf32>,
    } else {
    }
    %c0 = arith.constant 0 : index
    %c0_1 = arith.constant 0 : index
    %3 = vector.load %arg8[%c0, %c0_1] : memref<256x128xf32, #tpu.memory_space<vmem>>, vector<256x128xf32>
    %c0_2 = arith.constant 0 : index
    %c0_3 = arith.constant 0 : index
    %4 = vector.load %arg3[%c0_2, %c0_3] : memref<256x128xbf16, #tpu.memory_space<vmem>>, vector<256x128xbf16>
    %c0_4 = arith.constant 0 : index
    %c0_5 = arith.constant 0 : index
    %5 = vector.load %arg4[%c0_4, %c0_5] : memref<128x128xbf16, #tpu.memory_space<vmem>>, vector<128x128xbf16>
    %cst = arith.constant dense<0.000000e+00> : vector<256x128xf32>
    %6 = tpu.matmul %4, %5, %cst {dimension_numbers = #tpu.dot_dimension_numbers<[1], [0], [0], [1], [0, 0, 1, 1], [], []>} : vector<256x128xbf16>, vector<128x128xbf16>, vector<256x128xf32> -> vector<256x128xf32>
    %7 = arith.addf %3, %6 : vector<256x128xf32>
    %c0_6 = arith.constant 0 : index
    %c0_7 = arith.constant 0 : index
    %8 = vector.load %arg8[%c0_6, %c0_7] : memref<256x128xf32, #tpu.memory_space<vmem>>, vector<256x128xf32>
    tpu.vector_store %arg8[%c0_6, %c0_7], %7 {strides = array<i32>} : memref<256x128xf32, #tpu.memory_space<vmem>>, vector<256x128xf32>,
    %c0_i32_8 = arith.constant 0 : i32
    %9 = arith.cmpi eq, %arg2, %c0_i32_8 : i32
    %10 = arith.extui %9 : i1 to i32
    %c0_i32_9 = arith.constant 0 : i32
    %11 = arith.cmpi ne, %10, %c0_i32_9 : i32
    scf.if %11 {
      %c0_10 = arith.constant 0 : index
      %c0_11 = arith.constant 0 : index
      %12 = vector.load %arg8[%c0_10, %c0_11] : memref<256x128xf32, #tpu.memory_space<vmem>>, vector<256x128xf32>
      %c0_12 = arith.constant 0 : index
      %c0_13 = arith.constant 0 : index
      %13 = vector.load %arg5[%c0_12, %c0_13] : memref<1x128xf32, #tpu.memory_space<vmem>>, vector<1x128xf32>
      %14 = vector.broadcast %13 : vector<1x128xf32> to vector<256x128xf32>
      %15 = arith.mulf %12, %14 : vector<256x128xf32>
      %c0_14 = arith.constant 0 : index
      %c0_15 = arith.constant 0 : index
      %16 = vector.load %arg6[%c0_14, %c0_15] : memref<1x128xf32, #tpu.memory_space<vmem>>, vector<1x128xf32>
      %17 = vector.broadcast %16 : vector<1x128xf32> to vector<256x128xf32>
      %18 = arith.addf %15, %17 : vector<256x128xf32>
      %cst_16 = arith.constant 0.000000e+00 : f32
      %19 = vector.broadcast %cst_16 : f32 to vector<256x128xf32>
      %20 = arith.cmpf oge, %18, %19 : vector<256x128xf32>
      %cst_17 = arith.constant 2.000000e-01 : f32
      %21 = vector.broadcast %cst_17 : f32 to vector<256x128xf32>
      %22 = arith.mulf %21, %18 : vector<256x128xf32>
      %23 = arith.select %20, %18, %22 : vector<256x128xi1>, vector<256x128xf32>
      %c0_18 = arith.constant 0 : index
      %c0_19 = arith.constant 0 : index
      %24 = vector.load %arg7[%c0_18, %c0_19] : memref<256x128xf32, #tpu.memory_space<vmem>>, vector<256x128xf32>
      tpu.vector_store %arg7[%c0_18, %c0_19], %23 {strides = array<i32>} : memref<256x128xf32, #tpu.memory_space<vmem>>, vector<256x128xf32>,
    } else {
    }
    return
  }
  func.func @transform_0(%arg0: i32, %arg1: i32, %arg2: i32) -> (i32, i32) {
    %c0_i32 = arith.constant 0 : i32
    return %arg0, %arg2 : i32, i32
  }
  func.func @transform_1(%arg0: i32, %arg1: i32, %arg2: i32) -> (i32, i32) {
    %c0_i32 = arith.constant 0 : i32
    return %arg2, %arg1 : i32, i32
  }
  func.func @transform_2(%arg0: i32, %arg1: i32, %arg2: i32) -> (i32, i32) {
    %c0_i32 = arith.constant 0 : i32
    %c0_i32_0 = arith.constant 0 : i32
    return %c0_i32, %arg1 : i32, i32
  }
  func.func @transform_3(%arg0: i32, %arg1: i32, %arg2: i32) -> (i32, i32) {
    %c0_i32 = arith.constant 0 : i32
    %c0_i32_0 = arith.constant 0 : i32
    return %c0_i32, %arg1 : i32, i32
  }
  func.func @transform_4(%arg0: i32, %arg1: i32, %arg2: i32) -> (i32, i32) {
    %c0_i32 = arith.constant 0 : i32
    return %arg0, %arg1 : i32, i32
  }
}

</mosaic_0001>

<bundles_post_ra>
// kernel: tpu_custom_call.1
= control target key start
LH: loop header
LB: loop body
LE: loop exit
PB: predicated region body
PF: predicated region fallthrough
CT: control target
= control target key end

     0   :  { %s1797_s0 = inlined_call_operand.hbm [shape: bf16[512,128], index: 0, kind: input, shape index: {}]   ;;  %s1798_s1 = inlined_call_operand.hbm [shape: bf16[128,128], index: 1, kind: input, shape index: {}]   ;;  %s1799_s2 = inlined_call_operand.vmem [shape: f32[1,128], index: 2, kind: input, shape index: {}]   ;;  %s1800_s3 = inlined_call_operand.vmem [shape: f32[1,128], index: 3, kind: input, shape index: {}]   ;;  %s1801_s4 = inlined_call_operand.hbm [shape: f32[512,128], index: 4, kind: output, shape index: {}]  }
   0x1   :  { %1805 = sst [smem:[#allocation13_spill]] %s1798_s1 }
   0x2   :  { %9 = vsyncpa [#allocation4], 0 }
   0x3   :  { %11 = vsyncpa [#allocation4 + $0x1], 0 }
   0x4   :  { %12 = vsyncpa [#allocation7], 0 }
   0x5   :  { %13 = vsyncpa [#allocation5], 0 }
   0x6   :  { %15 = vsyncpa [#allocation5 + $0x1], 0  ;;  %s1514_s15 = smov 0   ;;  %s1516_s16 = smov 0  }
   0x7   :  { %s1518_s17 = smov 0   ;;  %s1520_s18 = smov 0  }
   0x8   :  { %s1522_s19 = smov 0   ;;  %s1524_s20 = smov 0  }
   0x9 LB: > { %s1092_s21 = sadd.s32 4294967295, %s1482_s20   ;;  %s1093_s22 = sadd.s32 4294967294, %s1482_s20   ;;  %s1482_s20 = sphi %s1524_s20, %s21_s20   ;;  %s1478_s19 = sphi %s1522_s19, %s1822_s19   ;;  %s1474_s18 = sphi %s1520_s18, %s1821_s18   ;;  %s1470_s17 = sphi %s1518_s17, %s1820_s17   ;;  %s1466_s16 = sphi %s1516_s16, %s1819_s16   ;;  %s1462_s15 = sphi %s1514_s15, %s1818_s15  }
   0xa   : > { %p62_p0 = scmp.ne.s32.totalorder %s1466_s16, %s1462_s15  ;;  %p1548_p1 = scmp.eq.s32.totalorder %s1092_s21, 0 }
   0xb   : > { %p1552_p2 = scmp.eq.s32.totalorder %s1092_s21, 1  ;;  %p174_p3 = scmp.eq.s32.totalorder %s1093_s22, 1 }
   0xc   : > { %p1558_p4 = por %p1548_p1, %p62_p0  ;;  %p1094_p5 = scmp.ge.s32.totalorder %s1482_s20, 1 }
   0xd   : > { %p1563_p6 = por %p174_p3, %p62_p0  ;;  %p181_p7 = scmp.lt.s32.totalorder %s1482_s20, 3 }
   0xe   : > { %s1810_s1 = sld [smem:[#allocation13_spill]]  ;;  %s1484_s5 = smov [#allocation6]  }
   0xf   : > { %p1571_p8 = pnand %p1094_p5, %p181_p7  ;;  %s198_s6 = sshll.u32 %s1484_s5, 4  ;;  %s199_s6 = int_to_ptr.vmem [resolvable:$true] %s198_s6 }
  0x10   : > { %p1098_p11 = scmp.ge.s32.totalorder %s1482_s20, 2  ;;  %s1802_s7 = smov 64  }
  0x11   : > { %p1265_p9 = pneg %p1571_p8  ;;  %s1803_s8 = smov 4  }
  0x12   : > { %s40_s9 = sadd.s32 1, %s1478_s19  ;;  %s49_s10 = sadd.s32 1, %s1470_s17 }
  0x13   : > { %p1266_p10 = pnand %p1265_p9, %p1548_p1  ;;  %p42_p12 = scmp.ge.s32.totalorder %s40_s9, 2 }
  0x14   : > { %s196_s29 = sshll.u32 %s1810_s1, 4  ;;  %p56_p13 = scmp.ne.s32.totalorder %s1470_s17, %s1466_s16  ;;  %s197_s29 = int_to_ptr.hbm [resolvable:$true] %s196_s29 }
  0x15   : > { %1268 = dma.hbm_to_vmem [thread:$0]  (!%p1266_p10), %s197_s29, 1024, %s199_s6, [#allocation7], %s1802_s7, %s1802_s7, %s1803_s8  }
  0x16   : > { %p57_p0 = scmp.eq.s32.totalorder %s1482_s20, 0  ;;  %s1824_s9 = smov (%p42_p12, %s40_s9), 0 }
  0x17   : > { %1812 = sst [smem:[#allocation12_spill]] %s1824_s9  ;;  %p1596_p5 = por %p1552_p2, %p56_p13 }
  0x18   : > { %p1590_p3 = por %p57_p0, %p56_p13  ;;  %s44_s13 = ssub.s32 %s1478_s19, %s1824_s9 }
  0x19   : > { %p1278_p7 = scmp.lt.s32.totalorder %s1482_s20, 2  ;;  %p47_p9 = scmp.eq.s32.totalorder %s44_s13, 0 }
  0x1a   : > { %s224_s14 = sand.u32 1, %s1470_s17   ;;  %s1207_s27 = sshll.u32 %s1478_s19, 7 }
  0x1b   : > { %s1099_s21 = sshll.u32 %s224_s14, 7  ;;  %s234_s5 = scalar_lea.hbm %s1797_s0, %s1207_s27 }
  0x1c   : > { %s1605_s22 = scalar_select %p47_p9, %s1470_s17, %s49_s10  }
  0x1d   : > { %s228_s6 = scalar_lea.vmem [#allocation3], %s1099_s21  ;;  %s235_s24 = sshll.u32 %s234_s5, 4  ;;  %s236_s24 = int_to_ptr.hbm [resolvable:$true] %s235_s24 }
  0x1e   : > { %s237_s7 = sshll.u32 %s228_s6, 4  ;;  %p1270_p2 = pnand %p1278_p7, %p1590_p3  ;;  %s238_s7 = int_to_ptr.vmem [resolvable:$true] %s237_s7 }
  0x1f   : > { %s225_s8 = scalar_lea.sflag [#allocation4], %s224_s14  ;;  %s1815_s1 = smov 4  }
  0x20   : > { %s1816_s9 = smov 64   ;;  %249 = sbr.rel (%p1571_p8) target bundleno = 273 (0x111), region = 36 }
  0x21   : > { %1272 = dma.hbm_to_vmem [thread:$0]  (!%p1270_p2), %s236_s24, 2048, %s238_s7, %s225_s8, %s1816_s9, %s1816_s9, %s1815_s1  }
  0x22   : > { %s1619_s10 = sand.u32 (!%p1571_p8), 1, %s1466_s16  }
  0x23   : > { %s1103_s13 = sshll.u32 (!%p1571_p8), %s1619_s10, 7  ;;  %s252_s21 = scalar_lea.sflag (!%p1571_p8), [#allocation4], %s1619_s10 }
  0x24   : > { %s1623_s27 = scalar_lea.vmem (!%p1571_p8), [#allocation3], %s1103_s13 }
  0x25   : > { %1449 = dma.done.wait (%p1558_p4), %s252_s21, 2048  }
  0x26   : > { %1451 = vsyncadd (%p1558_p4), %s252_s21, 4294965248 }
  0x27   : > { %1453 = dma.done.wait (%p1548_p1), [#allocation7], 1024  }
  0x28   : > { %1455 = vsyncadd (%p1548_p1), [#allocation7], 4294966272  ;;  %v1231_v0 = vld [vmem:[#allocation6 + $0x38] sm:$0xff]  ;;  %v1230_v1 = vld [vmem:[#allocation6 + $0x30] sm:$0xff]  ;;  %s1105_s7 = sshll.u32 %s1619_s10, 8  ;;  %s1232_s9 = sshll.u32 %s1474_s18, 8 }
  0x29   : > { %561 = vmatpush.bf16.msra.mxu0 %v1231_v0  ;;  %1233 = vmatpush.bf16.msra.mxu1 %v1231_v0  ;;  %v1229_v2 = vld [vmem:[#allocation6 + $0x28] sm:$0xff]  ;;  %v1228_v3 = vld [vmem:[#allocation6 + $0x20] sm:$0xff]  ;;  %v1227_v4 = vld [vmem:[#allocation6 + $0x18] sm:$0xff]  ;;  %s1664_s8 = scalar_lea.vmem [#allocation8], %s1105_s7  ;;  %s962_s14 = scalar_lea.hbm %s1801_s4, %s1232_s9 }
  0x2a   : > { %1234 = vmatpush.bf16.msra.mxu2 %v1231_v0  ;;  %1235 = vmatpush.bf16.msra.mxu3 %v1231_v0  ;;  %v1226_v5 = vld [vmem:[#allocation6 + $0x10] sm:$0xff]  ;;  %v1225_v6 = vld [vmem:[#allocation6 + $0x8] sm:$0xff]  ;;  %v1224_v7 = vld [vmem:[#allocation6] sm:$0xff]  ;;  %s963_s28 = sshll.u32 %s1664_s8, 4  ;;  %s965_s29 = sshll.u32 %s962_s14, 4  ;;  %s964_s28 = int_to_ptr.vmem [resolvable:$true] %s963_s28  ;;  %s966_s29 = int_to_ptr.hbm [resolvable:$true] %s965_s29 }
  0x2b   : > { %v1208_v8 = vld [vmem:[%s1623_s27] sm:$0xff]  ;;  %v1209_v12 = vld [vmem:[%s1623_s27 + $0x8] sm:$0xff]  ;;  %v1210_v16 = vld [vmem:[%s1623_s27 + $0x10] sm:$0xff]  ;;  %s950_s5 = scalar_lea.sflag [#allocation5], %s1619_s10  ;;  %s1410_s6 = sshra.s32 %s966_s29, 4  ;;  %s1411_s6 = int_to_ptr.hbm [resolvable:$true] %s1410_s6 }
  0x2c   : > { %v1212_v9 = vld [vmem:[%s1623_s27 + $0x20] sm:$0xff]  ;;  %v1213_v13 = vld [vmem:[%s1623_s27 + $0x28] sm:$0xff]  ;;  %v1214_v17 = vld [vmem:[%s1623_s27 + $0x30] sm:$0xff]  ;;  %s1412_s24 = scalar_lea.hbm %s1411_s6, 256  ;;  %p1417_p10 = scmp.lt.s32.totalorder %s1411_s6, %s1801_s4 }
  0x2d   : > { %562 = vmatpush.bf16.msra.mxu0 %v1230_v1  ;;  %1236 = vmatpush.bf16.msra.mxu1 %v1230_v1  ;;  %v1216_v10 = vld [vmem:[%s1623_s27 + $0x40] sm:$0xff]  ;;  %v1217_v14 = vld [vmem:[%s1623_s27 + $0x48] sm:$0xff]  ;;  %v1218_v18 = vld [vmem:[%s1623_s27 + $0x50] sm:$0xff]  ;;  %p1413_p1 = scmp.ne.s32.totalorder %s1411_s6, %s1412_s24 }
  0x2e   : > { %1237 = vmatpush.bf16.msra.mxu2 %v1230_v1  ;;  %1238 = vmatpush.bf16.msra.mxu3 %v1230_v1  ;;  %v1220_v11 = vld [vmem:[%s1623_s27 + $0x60] sm:$0xff]  ;;  %v1221_v15 = vld [vmem:[%s1623_s27 + $0x68] sm:$0xff]  ;;  %v1222_v19 = vld [vmem:[%s1623_s27 + $0x70] sm:$0xff] }
  0x2f   : > { %v1211_v20 = vld [vmem:[%s1623_s27 + $0x18] sm:$0xff]  ;;  %v1652_v24 = vld [vmem:[%s1799_s2] ss:$0 sm:$0xff]  ;;  %p1414_p4 = pnand %p1413_p1, %p1596_p5 }
  0x30   : > { %v1215_v21 = vld [vmem:[%s1623_s27 + $0x38] sm:$0xff]  ;;  %v1657_v25 = vld [vmem:[%s1800_s3] ss:$0 sm:$0xff] }
  0x31   : > { %563 = vmatpush.bf16.msra.mxu0 %v1229_v2  ;;  %1239 = vmatpush.bf16.msra.mxu1 %v1229_v2  ;;  %v1219_v22 = vld [vmem:[%s1623_s27 + $0x58] sm:$0xff]  ;;  %p1415_p8 = pneg %p1414_p4 }
  0x32   : > { %1240 = vmatpush.bf16.msra.mxu2 %v1229_v2  ;;  %1241 = vmatpush.bf16.msra.mxu3 %v1229_v2  ;;  %v1223_v23 = vld [vmem:[%s1623_s27 + $0x78] sm:$0xff]  ;;  %s1416_s27 = scalar_lea.hbm %s1801_s4, 512 }
  0x33   : > { %p1418_p12 = scmp.lt.s32.totalorder %s1416_s27, %s1412_s24 }
  0x35   : > { %564 = vmatpush.bf16.msra.mxu0 %v1228_v3  ;;  %1242 = vmatpush.bf16.msra.mxu1 %v1228_v3  ;;  %p1419_p13 = por %p1418_p12, %p1417_p10 }
  0x36   : > { %1243 = vmatpush.bf16.msra.mxu2 %v1228_v3  ;;  %1244 = vmatpush.bf16.msra.mxu3 %v1228_v3 }
  0x37   : > { %p1420_p0 = pnand %p1419_p13, %p1415_p8 }
  0x39   : > { %565 = vmatpush.bf16.msra.mxu0 %v1227_v4  ;;  %1245 = vmatpush.bf16.msra.mxu1 %v1227_v4 }
  0x3a   : > { %1246 = vmatpush.bf16.msra.mxu2 %v1227_v4  ;;  %1247 = vmatpush.bf16.msra.mxu3 %v1227_v4 }
  0x3d   : > { %566 = vmatpush.bf16.msra.mxu0 %v1226_v5  ;;  %1248 = vmatpush.bf16.msra.mxu1 %v1226_v5 }
  0x3e   : > { %1249 = vmatpush.bf16.msra.mxu2 %v1226_v5  ;;  %1250 = vmatpush.bf16.msra.mxu3 %v1226_v5 }
  0x41   : > { %567 = vmatpush.bf16.msra.mxu0 %v1225_v6  ;;  %1251 = vmatpush.bf16.msra.mxu1 %v1225_v6 }
  0x42   : > { %1252 = vmatpush.bf16.msra.mxu2 %v1225_v6  ;;  %1253 = vmatpush.bf16.msra.mxu3 %v1225_v6 }
  0x45   : > { %568 = vmatpush.bf16.msra.mxu0 %v1224_v7  ;;  %1254 = vmatpush.bf16.msra.mxu1 %v1224_v7 }
  0x46   : > { %1255 = vmatpush.bf16.msra.mxu2 %v1224_v7  ;;  %1256 = vmatpush.bf16.msra.mxu3 %v1224_v7 }
  0x48   : > { %569 = vmatmul.bf16.vlgmr.msra.gmra.mxu0 %v1208_v8  ;;  %589 = vmatmul.bf16.vlgmr.msra.gmra.mxu1 %v1212_v9 }
  0x49   : > { %609 = vmatmul.bf16.vlgmr.msra.gmra.mxu2 %v1216_v10  ;;  %629 = vmatmul.bf16.vlgmr.msra.gmra.mxu3 %v1220_v11 }
  0x58   : > { %574 = vmatmul.bf16.gmra.mxu0 %v1209_v12  ;;  %594 = vmatmul.bf16.gmra.mxu1 %v1213_v13 }
  0x59   : > { %614 = vmatmul.bf16.gmra.mxu2 %v1217_v14  ;;  %634 = vmatmul.bf16.gmra.mxu3 %v1221_v15 }
  0x68   : > { %579 = vmatmul.bf16.gmra.mxu0 %v1210_v16  ;;  %599 = vmatmul.bf16.gmra.mxu1 %v1214_v17 }
  0x69   : > { %619 = vmatmul.bf16.gmra.mxu2 %v1218_v18  ;;  %639 = vmatmul.bf16.gmra.mxu3 %v1222_v19 }
  0x78   : > { %584 = vmatmul.bf16.gmra.mxu0 %v1211_v20  ;;  %604 = vmatmul.bf16.gmra.mxu1 %v1215_v21 }
  0x79   : > { %624 = vmatmul.bf16.gmra.mxu2 %v1219_v22  ;;  %644 = vmatmul.bf16.gmra.mxu3 %v1223_v23 }
  0xc5   : > { %v570_v26 = vpop.f32.mrf.mxu0  ;;  %v590_v27 = vpop.f32.mrf.mxu1 }
  0xc6   : > { %v753_v28 = vmul.f32 %v1652_v24, %v570_v26  ;;  %v761_v29 = vmul.f32 %v1652_v24, %v590_v27 }
  0xc8   : > { %v789_v30 = vadd.f32 %v1657_v25, %v753_v28  ;;  %v797_v31 = vadd.f32 %v1657_v25, %v761_v29 }
  0xca   : > { %vm821_vm0 = vcmp.ge.f32.partialorder %v789_v30, 0.0  ;;  %v853_v32 = vmul.f32 0.2, %v789_v30  ;;  %vm829_vm1 = vcmp.ge.f32.partialorder %v797_v31, 0.0  ;;  %v861_v33 = vmul.f32 0.2, %v797_v31 }
  0xcc   : > { %v885_v34 = vsel %vm821_vm0, %v789_v30, %v853_v32  ;;  %v893_v35 = vsel %vm829_vm1, %v797_v31, %v861_v33  ;;  %v610_v36 = vpop.f32.mrf.mxu2  ;;  %v630_v37 = vpop.f32.mrf.mxu3 }
  0xcd   : > { %917 = vst [vmem:[%s1664_s8] sm:$0xff] %v885_v34  ;;  %v769_v38 = vmul.f32 %v1652_v24, %v610_v36  ;;  %v777_v39 = vmul.f32 %v1652_v24, %v630_v37  ;;  %v572_v40 = vpop.f32.mrf.mxu0  ;;  %v592_v41 = vpop.f32.mrf.mxu1 }
  0xce   : > { %925 = vst [vmem:[%s1664_s8 + $0x40] sm:$0xff] %v893_v35  ;;  %v754_v42 = vmul.f32 %v1652_v24, %v572_v40  ;;  %v762_v43 = vmul.f32 %v1652_v24, %v592_v41 }
  0xcf   : > { %v805_v44 = vadd.f32 %v1657_v25, %v769_v38  ;;  %v813_v45 = vadd.f32 %v1657_v25, %v777_v39 }
  0xd0   : > { %v790_v46 = vadd.f32 %v1657_v25, %v754_v42  ;;  %v798_v47 = vadd.f32 %v1657_v25, %v762_v43 }
  0xd1   : > { %vm837_vm2 = vcmp.ge.f32.partialorder %v805_v44, 0.0  ;;  %v869_v48 = vmul.f32 0.2, %v805_v44  ;;  %vm845_vm3 = vcmp.ge.f32.partialorder %v813_v45, 0.0  ;;  %v877_v49 = vmul.f32 0.2, %v813_v45 }
  0xd2   : > { %vm822_vm4 = vcmp.ge.f32.partialorder %v790_v46, 0.0  ;;  %v854_v50 = vmul.f32 0.2, %v790_v46  ;;  %vm830_vm5 = vcmp.ge.f32.partialorder %v798_v47, 0.0  ;;  %v862_v51 = vmul.f32 0.2, %v798_v47 }
  0xd3   : > { %v901_v52 = vsel %vm837_vm2, %v805_v44, %v869_v48  ;;  %v909_v53 = vsel %vm845_vm3, %v813_v45, %v877_v49 }
  0xd4   : > { %933 = vst [vmem:[%s1664_s8 + $0x80] sm:$0xff] %v901_v52  ;;  %v886_v54 = vsel %vm822_vm4, %v790_v46, %v854_v50  ;;  %v894_v55 = vsel %vm830_vm5, %v798_v47, %v862_v51  ;;  %v612_v56 = vpop.f32.mrf.mxu2  ;;  %v632_v57 = vpop.f32.mrf.mxu3 }
  0xd5   : > { %941 = vst [vmem:[%s1664_s8 + $0xc0] sm:$0xff] %v909_v53  ;;  %v770_v58 = vmul.f32 %v1652_v24, %v612_v56  ;;  %v778_v59 = vmul.f32 %v1652_v24, %v632_v57  ;;  %v575_v60 = vpop.f32.mrf.mxu0  ;;  %v595_v61 = vpop.f32.mrf.mxu1 }
  0xd6   : > { %918 = vst [vmem:[%s1664_s8 + $0x8] sm:$0xff] %v886_v54  ;;  %v755_v62 = vmul.f32 %v1652_v24, %v575_v60  ;;  %v763_v63 = vmul.f32 %v1652_v24, %v595_v61 }
  0xd7   : > { %926 = vst [vmem:[%s1664_s8 + $0x48] sm:$0xff] %v894_v55  ;;  %v806_v0 = vadd.f32 %v1657_v25, %v770_v58  ;;  %v814_v1 = vadd.f32 %v1657_v25, %v778_v59 }
  0xd8   : > { %v791_v2 = vadd.f32 %v1657_v25, %v755_v62  ;;  %v799_v3 = vadd.f32 %v1657_v25, %v763_v63 }
  0xd9   : > { %vm838_vm6 = vcmp.ge.f32.partialorder %v806_v0, 0.0  ;;  %v870_v4 = vmul.f32 0.2, %v806_v0  ;;  %vm846_vm7 = vcmp.ge.f32.partialorder %v814_v1, 0.0  ;;  %v878_v5 = vmul.f32 0.2, %v814_v1 }
  0xda   : > { %vm823_vm8 = vcmp.ge.f32.partialorder %v791_v2, 0.0  ;;  %v855_v6 = vmul.f32 0.2, %v791_v2  ;;  %vm831_vm9 = vcmp.ge.f32.partialorder %v799_v3, 0.0  ;;  %v863_v7 = vmul.f32 0.2, %v799_v3 }
  0xdb   : > { %v902_v8 = vsel %vm838_vm6, %v806_v0, %v870_v4  ;;  %v910_v9 = vsel %vm846_vm7, %v814_v1, %v878_v5 }
  0xdc   : > { %934 = vst [vmem:[%s1664_s8 + $0x88] sm:$0xff] %v902_v8  ;;  %v887_v10 = vsel %vm823_vm8, %v791_v2, %v855_v6  ;;  %v895_v11 = vsel %vm831_vm9, %v799_v3, %v863_v7  ;;  %v615_v12 = vpop.f32.mrf.mxu2  ;;  %v635_v13 = vpop.f32.mrf.mxu3 }
  0xdd   : > { %942 = vst [vmem:[%s1664_s8 + $0xc8] sm:$0xff] %v910_v9  ;;  %v771_v14 = vmul.f32 %v1652_v24, %v615_v12  ;;  %v779_v15 = vmul.f32 %v1652_v24, %v635_v13  ;;  %v577_v16 = vpop.f32.mrf.mxu0  ;;  %v597_v17 = vpop.f32.mrf.mxu1 }
  0xde   : > { %919 = vst [vmem:[%s1664_s8 + $0x10] sm:$0xff] %v887_v10  ;;  %v756_v18 = vmul.f32 %v1652_v24, %v577_v16  ;;  %v764_v19 = vmul.f32 %v1652_v24, %v597_v17 }
  0xdf   : > { %927 = vst [vmem:[%s1664_s8 + $0x50] sm:$0xff] %v895_v11  ;;  %v807_v20 = vadd.f32 %v1657_v25, %v771_v14  ;;  %v815_v21 = vadd.f32 %v1657_v25, %v779_v15 }
  0xe0   : > { %v792_v22 = vadd.f32 %v1657_v25, %v756_v18  ;;  %v800_v23 = vadd.f32 %v1657_v25, %v764_v19 }
  0xe1   : > { %vm839_vm10 = vcmp.ge.f32.partialorder %v807_v20, 0.0  ;;  %v871_v26 = vmul.f32 0.2, %v807_v20  ;;  %vm847_vm11 = vcmp.ge.f32.partialorder %v815_v21, 0.0  ;;  %v879_v27 = vmul.f32 0.2, %v815_v21 }
  0xe2   : > { %vm824_vm12 = vcmp.ge.f32.partialorder %v792_v22, 0.0  ;;  %v856_v28 = vmul.f32 0.2, %v792_v22  ;;  %vm832_vm13 = vcmp.ge.f32.partialorder %v800_v23, 0.0  ;;  %v864_v29 = vmul.f32 0.2, %v800_v23 }
  0xe3   : > { %v903_v30 = vsel %vm839_vm10, %v807_v20, %v871_v26  ;;  %v911_v31 = vsel %vm847_vm11, %v815_v21, %v879_v27 }
  0xe4   : > { %935 = vst [vmem:[%s1664_s8 + $0x90] sm:$0xff] %v903_v30  ;;  %v888_v32 = vsel %vm824_vm12, %v792_v22, %v856_v28  ;;  %v896_v33 = vsel %vm832_vm13, %v800_v23, %v864_v29  ;;  %v617_v34 = vpop.f32.mrf.mxu2  ;;  %v637_v35 = vpop.f32.mrf.mxu3 }
  0xe5   : > { %943 = vst [vmem:[%s1664_s8 + $0xd0] sm:$0xff] %v911_v31  ;;  %v772_v36 = vmul.f32 %v1652_v24, %v617_v34  ;;  %v780_v37 = vmul.f32 %v1652_v24, %v637_v35  ;;  %v580_v38 = vpop.f32.mrf.mxu0  ;;  %v600_v39 = vpop.f32.mrf.mxu1 }
  0xe6   : > { %920 = vst [vmem:[%s1664_s8 + $0x18] sm:$0xff] %v888_v32  ;;  %v757_v40 = vmul.f32 %v1652_v24, %v580_v38  ;;  %v765_v41 = vmul.f32 %v1652_v24, %v600_v39 }
  0xe7   : > { %928 = vst [vmem:[%s1664_s8 + $0x58] sm:$0xff] %v896_v33  ;;  %v808_v42 = vadd.f32 %v1657_v25, %v772_v36  ;;  %v816_v43 = vadd.f32 %v1657_v25, %v780_v37 }
  0xe8   : > { %v793_v44 = vadd.f32 %v1657_v25, %v757_v40  ;;  %v801_v45 = vadd.f32 %v1657_v25, %v765_v41 }
  0xe9   : > { %vm840_vm14 = vcmp.ge.f32.partialorder %v808_v42, 0.0  ;;  %v872_v46 = vmul.f32 0.2, %v808_v42  ;;  %vm848_vm15 = vcmp.ge.f32.partialorder %v816_v43, 0.0  ;;  %v880_v47 = vmul.f32 0.2, %v816_v43 }
  0xea   : > { %vm825_vm0 = vcmp.ge.f32.partialorder %v793_v44, 0.0  ;;  %v857_v48 = vmul.f32 0.2, %v793_v44  ;;  %vm833_vm1 = vcmp.ge.f32.partialorder %v801_v45, 0.0  ;;  %v865_v49 = vmul.f32 0.2, %v801_v45 }
  0xeb   : > { %v904_v50 = vsel %vm840_vm14, %v808_v42, %v872_v46  ;;  %v912_v51 = vsel %vm848_vm15, %v816_v43, %v880_v47 }
  0xec   : > { %936 = vst [vmem:[%s1664_s8 + $0x98] sm:$0xff] %v904_v50  ;;  %v889_v52 = vsel %vm825_vm0, %v793_v44, %v857_v48  ;;  %v897_v53 = vsel %vm833_vm1, %v801_v45, %v865_v49  ;;  %v620_v54 = vpop.f32.mrf.mxu2  ;;  %v640_v55 = vpop.f32.mrf.mxu3 }
  0xed   : > { %944 = vst [vmem:[%s1664_s8 + $0xd8] sm:$0xff] %v912_v51  ;;  %v773_v56 = vmul.f32 %v1652_v24, %v620_v54  ;;  %v781_v57 = vmul.f32 %v1652_v24, %v640_v55  ;;  %v582_v58 = vpop.f32.mrf.mxu0  ;;  %v602_v59 = vpop.f32.mrf.mxu1 }
  0xee   : > { %921 = vst [vmem:[%s1664_s8 + $0x20] sm:$0xff] %v889_v52  ;;  %v758_v60 = vmul.f32 %v1652_v24, %v582_v58  ;;  %v766_v61 = vmul.f32 %v1652_v24, %v602_v59 }
  0xef   : > { %929 = vst [vmem:[%s1664_s8 + $0x60] sm:$0xff] %v897_v53  ;;  %v809_v62 = vadd.f32 %v1657_v25, %v773_v56  ;;  %v817_v63 = vadd.f32 %v1657_v25, %v781_v57 }
  0xf0   : > { %v794_v0 = vadd.f32 %v1657_v25, %v758_v60  ;;  %v802_v1 = vadd.f32 %v1657_v25, %v766_v61 }
  0xf1   : > { %vm841_vm2 = vcmp.ge.f32.partialorder %v809_v62, 0.0  ;;  %v873_v2 = vmul.f32 0.2, %v809_v62  ;;  %vm849_vm3 = vcmp.ge.f32.partialorder %v817_v63, 0.0  ;;  %v881_v3 = vmul.f32 0.2, %v817_v63 }
  0xf2   : > { %vm826_vm4 = vcmp.ge.f32.partialorder %v794_v0, 0.0  ;;  %v858_v4 = vmul.f32 0.2, %v794_v0  ;;  %vm834_vm5 = vcmp.ge.f32.partialorder %v802_v1, 0.0  ;;  %v866_v5 = vmul.f32 0.2, %v802_v1 }
  0xf3   : > { %v905_v6 = vsel %vm841_vm2, %v809_v62, %v873_v2  ;;  %v913_v7 = vsel %vm849_vm3, %v817_v63, %v881_v3 }
  0xf4   : > { %937 = vst [vmem:[%s1664_s8 + $0xa0] sm:$0xff] %v905_v6  ;;  %v890_v8 = vsel %vm826_vm4, %v794_v0, %v858_v4  ;;  %v898_v9 = vsel %vm834_vm5, %v802_v1, %v866_v5  ;;  %v622_v10 = vpop.f32.mrf.mxu2  ;;  %v642_v11 = vpop.f32.mrf.mxu3 }
  0xf5   : > { %945 = vst [vmem:[%s1664_s8 + $0xe0] sm:$0xff] %v913_v7  ;;  %v774_v12 = vmul.f32 %v1652_v24, %v622_v10  ;;  %v782_v13 = vmul.f32 %v1652_v24, %v642_v11  ;;  %v585_v14 = vpop.f32.mrf.mxu0  ;;  %v605_v15 = vpop.f32.mrf.mxu1 }
  0xf6   : > { %922 = vst [vmem:[%s1664_s8 + $0x28] sm:$0xff] %v890_v8  ;;  %v759_v16 = vmul.f32 %v1652_v24, %v585_v14  ;;  %v767_v17 = vmul.f32 %v1652_v24, %v605_v15 }
  0xf7   : > { %930 = vst [vmem:[%s1664_s8 + $0x68] sm:$0xff] %v898_v9  ;;  %v810_v18 = vadd.f32 %v1657_v25, %v774_v12  ;;  %v818_v19 = vadd.f32 %v1657_v25, %v782_v13 }
  0xf8   : > { %v795_v20 = vadd.f32 %v1657_v25, %v759_v16  ;;  %v803_v21 = vadd.f32 %v1657_v25, %v767_v17 }
  0xf9   : > { %vm842_vm6 = vcmp.ge.f32.partialorder %v810_v18, 0.0  ;;  %v874_v22 = vmul.f32 0.2, %v810_v18  ;;  %vm850_vm7 = vcmp.ge.f32.partialorder %v818_v19, 0.0  ;;  %v882_v23 = vmul.f32 0.2, %v818_v19 }
  0xfa   : > { %vm827_vm8 = vcmp.ge.f32.partialorder %v795_v20, 0.0  ;;  %v859_v26 = vmul.f32 0.2, %v795_v20  ;;  %vm835_vm9 = vcmp.ge.f32.partialorder %v803_v21, 0.0  ;;  %v867_v27 = vmul.f32 0.2, %v803_v21 }
  0xfb   : > { %v906_v28 = vsel %vm842_vm6, %v810_v18, %v874_v22  ;;  %v914_v29 = vsel %vm850_vm7, %v818_v19, %v882_v23 }
  0xfc   : > { %938 = vst [vmem:[%s1664_s8 + $0xa8] sm:$0xff] %v906_v28  ;;  %v891_v30 = vsel %vm827_vm8, %v795_v20, %v859_v26  ;;  %v899_v31 = vsel %vm835_vm9, %v803_v21, %v867_v27  ;;  %v625_v32 = vpop.f32.mrf.mxu2  ;;  %v645_v33 = vpop.f32.mrf.mxu3 }
  0xfd   : > { %946 = vst [vmem:[%s1664_s8 + $0xe8] sm:$0xff] %v914_v29  ;;  %v775_v34 = vmul.f32 %v1652_v24, %v625_v32  ;;  %v783_v35 = vmul.f32 %v1652_v24, %v645_v33  ;;  %v587_v36 = vpop.f32.mrf.mxu0  ;;  %v607_v37 = vpop.f32.mrf.mxu1 }
  0xfe   : > { %923 = vst [vmem:[%s1664_s8 + $0x30] sm:$0xff] %v891_v30  ;;  %v760_v38 = vmul.f32 %v1652_v24, %v587_v36  ;;  %v768_v39 = vmul.f32 %v1652_v24, %v607_v37 }
  0xff   : > { %931 = vst [vmem:[%s1664_s8 + $0x70] sm:$0xff] %v899_v31  ;;  %v811_v40 = vadd.f32 %v1657_v25, %v775_v34  ;;  %v819_v41 = vadd.f32 %v1657_v25, %v783_v35 }
 0x100   : > { %v796_v42 = vadd.f32 %v1657_v25, %v760_v38  ;;  %v804_v43 = vadd.f32 %v1657_v25, %v768_v39 }
 0x101   : > { %vm843_vm10 = vcmp.ge.f32.partialorder %v811_v40, 0.0  ;;  %v875_v44 = vmul.f32 0.2, %v811_v40  ;;  %vm851_vm11 = vcmp.ge.f32.partialorder %v819_v41, 0.0  ;;  %v883_v45 = vmul.f32 0.2, %v819_v41 }
 0x102   : > { %vm828_vm12 = vcmp.ge.f32.partialorder %v796_v42, 0.0  ;;  %v860_v46 = vmul.f32 0.2, %v796_v42  ;;  %vm836_vm13 = vcmp.ge.f32.partialorder %v804_v43, 0.0  ;;  %v868_v47 = vmul.f32 0.2, %v804_v43 }
 0x103   : > { %v907_v48 = vsel %vm843_vm10, %v811_v40, %v875_v44  ;;  %v915_v49 = vsel %vm851_vm11, %v819_v41, %v883_v45 }
 0x104   : > { %939 = vst [vmem:[%s1664_s8 + $0xb0] sm:$0xff] %v907_v48  ;;  %v892_v50 = vsel %vm828_vm12, %v796_v42, %v860_v46  ;;  %v900_v51 = vsel %vm836_vm13, %v804_v43, %v868_v47  ;;  %v627_v52 = vpop.f32.mrf.mxu2  ;;  %v647_v53 = vpop.f32.mrf.mxu3 }
 0x105   : > { %947 = vst [vmem:[%s1664_s8 + $0xf0] sm:$0xff] %v915_v49  ;;  %v776_v54 = vmul.f32 %v1652_v24, %v627_v52  ;;  %v784_v55 = vmul.f32 %v1652_v24, %v647_v53 }
 0x106   : > { %924 = vst [vmem:[%s1664_s8 + $0x38] sm:$0xff] %v892_v50 }
 0x107   : > { %932 = vst [vmem:[%s1664_s8 + $0x78] sm:$0xff] %v900_v51  ;;  %v812_v56 = vadd.f32 %v1657_v25, %v776_v54  ;;  %v820_v57 = vadd.f32 %v1657_v25, %v784_v55 }
 0x109   : > { %vm844_vm14 = vcmp.ge.f32.partialorder %v812_v56, 0.0  ;;  %v876_v58 = vmul.f32 0.2, %v812_v56  ;;  %vm852_vm15 = vcmp.ge.f32.partialorder %v820_v57, 0.0  ;;  %v884_v59 = vmul.f32 0.2, %v820_v57 }
 0x10b   : > { %v908_v60 = vsel %vm844_vm14, %v812_v56, %v876_v58  ;;  %v916_v61 = vsel %vm852_vm15, %v820_v57, %v884_v59 }
 0x10c   : > { %940 = vst [vmem:[%s1664_s8 + $0xb8] sm:$0xff] %v908_v60 }
 0x10d   : > { %948 = vst [vmem:[%s1664_s8 + $0xf8] sm:$0xff] %v916_v61 }
 0x10e   : > { %1423 = shalt.err (!%p1420_p0)
}
 0x10f   : > { %s1487_s10 = smov 128   ;;  %s1488_s25 = smov 8  }
 0x110   : > { %1263 = dma.vmem_to_hbm [thread:$0]  (%p1596_p5), %s964_s28, 4096, %s966_s29, %s950_s5, %s1487_s10, %s1487_s10, %s1488_s25  }
 0x111 PF: > { %s980_s30 = sand.u32 1, %s1462_s15   ;;  %p1274_p3 = pnand %p1098_p11, %p1563_p6 }
 0x112   : > { %s981_s7 = scalar_lea.sflag [#allocation5], %s980_s30 }
 0x113   : > { %p1275_p7 = pneg %p1274_p3 }
 0x115   : > { %1457 = dma.done.wait (%p1275_p7), %s981_s7, 4096  }
 0x116   : > { %1459 = vsyncadd (%p1275_p7), %s981_s7, 4294963200  ;;  %s21_s20 = sadd.s32 1, %s1482_s20   ;;  %s1817_s12 = sld [smem:[#allocation12_spill]] }
 0x117   : > { %p18_p9 = scmp.ge.s32.totalorder %s21_s20, 4   ;;  %s1818_s15 = smov %s1466_s16 }
 0x118   : > { %s1819_s16 = smov %s1470_s17  ;;  %s1820_s17 = smov %s1605_s22 }
 0x119   : > { %s1821_s18 = smov %s1478_s19  ;;  %20 = sbr.rel (!%p18_p9) target bundleno = 9 (0x9), region = 100 }
 0x11c   : > { %s1822_s19 = smov %s1817_s12 }
 0x11e   :  { %987 = vsyncpa [#allocation4], 1 }
 0x11f   :  { %989 = vsyncpa [#allocation4 + $0x1], 1 }
 0x120   :  { %990 = vsyncpa [#allocation7], 1 }
 0x121   :  { %991 = vsyncpa [#allocation5], 1 }
 0x122   :  { %993 = vsyncpa [#allocation5 + $0x1], 1 }

</bundles_post_ra>
